<compile_context>
chip_gen: v6e
topology: v6e:2x2x1
jax: 0.10.0
libtpu: 0.0.40
codegen_flags: <defaults>
</compile_context>

<pallas_src>
from functools import partial

import jax
import jax.numpy as jnp
from jax.experimental import pallas as pl
from jax.experimental.pallas import tpu as pltpu


# -----------------------------------------------------------------------------
# Kernel: LayerNorm over the last axis for a (tm, D) block of rows.
#   x_ref : (tm, D)  input rows
#   g_ref : (1, D)   gamma (resident across the grid)
#   b_ref : (1, D)   beta  (resident across the grid)
#   o_ref : (tm, D)  output rows
# -----------------------------------------------------------------------------
def layernorm_kernel(x_ref, g_ref, b_ref, o_ref, *, eps, inv_d):
    x = x_ref[...].astype(jnp.float32)                         # (tm, D)

    # One-pass statistics: keeps only x (f32) live across the reductions.
    s1 = jnp.sum(x, axis=-1, keepdims=True)                    # (tm, 1)
    s2 = jnp.sum(x * x, axis=-1, keepdims=True)                # (tm, 1)
    mean = s1 * jnp.float32(inv_d)
    var = jnp.maximum(s2 * jnp.float32(inv_d) - mean * mean, jnp.float32(0.0))
    std = jnp.sqrt(var)

    # One reciprocal per row (EUP path), broadcast over the lane axis.
    inv = pl.reciprocal(std + jnp.float32(eps), approx=False)  # (tm, 1)

    gamma = g_ref[...].astype(jnp.float32)                     # (1, D) -> bcast
    beta = b_ref[...].astype(jnp.float32)

    y = gamma * ((x - mean) * inv) + beta
    o_ref[...] = y.astype(o_ref.dtype)


def _choose_row_tile(n_rows, d, dtype_bytes, *,
                     max_rows=512, vmem_budget=12 * 1024 * 1024):
    """Pick a row tile (multiple of 8) from a dtype/scratch-aware VMEM budget.

    Per-row bytes:
      DMA buffers : in + out blocks, double-buffered, in the input dtype
      f32 scratch : ~3 live (tm, D) f32 temps inside the kernel (upcast, x*x, y)
    """
    if n_rows <= 8:
        return n_rows                                   # full-extent block is legal

    dma_bytes_per_row = 2 * 2 * d * dtype_bytes         # (in+out) x double-buffer
    scratch_bytes_per_row = 3 * d * 4                   # f32 intermediates
    per_row = dma_bytes_per_row + scratch_bytes_per_row

    rows_by_vmem = max(8, vmem_budget // per_row)
    tm = min(n_rows, max_rows, rows_by_vmem)
    tm = max(8, (tm // 8) * 8)

    # Megacore balance (v7x): make sure the single parallel axis has >= 2 steps.
    if pl.cdiv(n_rows, tm) < 2:
        tm = max(8, (((n_rows + 1) // 2 + 7) // 8) * 8)

    return tm


def pallas_layer_norm(x, gamma, beta, *, eps=1e-6):
    """x: (..., D); gamma, beta: (D,).  Returns same shape/dtype as x."""
    orig_shape = x.shape
    d = orig_shape[-1]
    x2 = x.reshape(-1, d)
    n = x2.shape[0]

    tm = _choose_row_tile(n, d, x2.dtype.itemsize)
    grid = (pl.cdiv(n, tm),)                 # partial last block handled by Pallas

    g2 = gamma.reshape(1, d)
    b2 = beta.reshape(1, d)

    out = pl.pallas_call(
        partial(layernorm_kernel, eps=float(eps), inv_d=1.0 / float(d)),
        out_shape=jax.ShapeDtypeStruct((n, d), x.dtype),
        grid_spec=pltpu.PrefetchScalarGridSpec(
            num_scalar_prefetch=0,
            grid=grid,
            in_specs=[
                pl.BlockSpec((tm, d), lambda i: (i, 0)),   # x rows (streamed)
                pl.BlockSpec((1, d), lambda i: (0, 0)),    # gamma (resident)
                pl.BlockSpec((1, d), lambda i: (0, 0)),    # beta  (resident)
            ],
            out_specs=pl.BlockSpec((tm, d), lambda i: (i, 0)),
        ),
        compiler_params=pltpu.CompilerParams(
            dimension_semantics=("parallel",),
            vmem_limit_bytes=32 * 1024 * 1024,   # explicit (v5e default is 16 MiB)
        ),
    )(x2, g2, b2)

    return out.reshape(orig_shape)


# -----------------------------------------------------------------------------
# Pure-JAX reference (mirrors the PyTorch forward exactly)
# -----------------------------------------------------------------------------
def reference_layer_norm(x, gamma, beta, *, eps=1e-6):
    mean = jnp.mean(x, axis=-1, keepdims=True)
    var = jnp.mean((x - mean) ** 2, axis=-1, keepdims=True)   # unbiased=False
    std = jnp.sqrt(var)
    return gamma * (x - mean) / (std + eps) + beta


if __name__ == "__main__":
    eps = 1e-6
    key = jax.random.PRNGKey(0)
    k_x1, k_x2, k_g, k_b = jax.random.split(key, 4)

    D = 128
    # Random affine params (module inits to ones/zeros; random exercises them).
    gamma = 1.0 + 0.1 * jax.random.normal(k_g, (D,), jnp.float32)
    beta = 0.1 * jax.random.normal(k_b, (D,), jnp.float32)

    # Case 1: rows divisible by the tile (B=2, S=8 -> 16 rows, 2 grid steps).
    x1 = jax.random.normal(k_x1, (2, 8, D), jnp.float32) * 2.0 + 0.5
    out1 = jax.block_until_ready(pallas_layer_norm(x1, gamma, beta, eps=eps))
    ref1 = reference_layer_norm(x1, gamma, beta, eps=eps)
    assert out1.shape == x1.shape and out1.dtype == x1.dtype
    assert jnp.allclose(out1, ref1, atol=1e-5, rtol=1e-5), (
        f"max abs err = {jnp.max(jnp.abs(out1 - ref1))}")

    # Case 2: row count NOT a multiple of the tile (3*5 = 15 rows) -> exercises
    # the masked partial last block (no pad / slice round-trips).
    x2 = jax.random.normal(k_x2, (3, 5, D), jnp.float32) - 1.0
    out2 = jax.block_until_ready(pallas_layer_norm(x2, gamma, beta, eps=eps))
    ref2 = reference_layer_norm(x2, gamma, beta, eps=eps)
    assert out2.shape == x2.shape and out2.dtype == x2.dtype
    assert jnp.allclose(out2, ref2, atol=1e-5, rtol=1e-5), (
        f"max abs err = {jnp.max(jnp.abs(out2 - ref2))}")

    print("KERNEL_OK")
</pallas_src>

<mosaic_0001>
module attributes {stable_mosaic.version = 11 : i64} {
  func.func @layernorm_kernel(%arg0: i32, %arg1: memref<8x128xf32, #tpu.memory_space<vmem>>, %arg2: memref<1x128xf32, #tpu.memory_space<vmem>>, %arg3: memref<1x128xf32, #tpu.memory_space<vmem>>, %arg4: memref<8x128xf32, #tpu.memory_space<vmem>>) attributes {dimension_semantics = [#tpu.dimension_semantics<parallel>], iteration_bounds = array<i64: 2>, scalar_prefetch = 0 : i64, scratch_operands = 0 : i64, tpu.core_type = #tpu.core_type<tc>, window_params = [{transform_indices = @transform_0, window_bounds = array<i64: 8, 128>}, {pipeline_mode = #tpu.pipeline_mode<synchronous>, transform_indices = @transform_1, window_bounds = array<i64: 1, 128>}, {pipeline_mode = #tpu.pipeline_mode<synchronous>, transform_indices = @transform_2, window_bounds = array<i64: 1, 128>}, {transform_indices = @transform_3, window_bounds = array<i64: 8, 128>}]} {
    %c0 = arith.constant 0 : index
    %c0_0 = arith.constant 0 : index
    %0 = vector.load %arg1[%c0, %c0_0] : memref<8x128xf32, #tpu.memory_space<vmem>>, vector<8x128xf32>
    %cst = arith.constant dense<0.000000e+00> : vector<8xf32>
    %1 = vector.multi_reduction <add>, %0, %cst [1] : vector<8x128xf32> to vector<8xf32>
    %2 = vector.shape_cast %1 : vector<8xf32> to vector<8x1xf32>
    %3 = arith.mulf %0, %0 : vector<8x128xf32>
    %cst_1 = arith.constant dense<0.000000e+00> : vector<8xf32>
    %4 = vector.multi_reduction <add>, %3, %cst_1 [1] : vector<8x128xf32> to vector<8xf32>
    %5 = vector.shape_cast %4 : vector<8xf32> to vector<8x1xf32>
    %cst_2 = arith.constant 7.812500e-03 : f32
    %6 = vector.broadcast %cst_2 : f32 to vector<8x1xf32>
    %7 = arith.mulf %2, %6 : vector<8x1xf32>
    %cst_3 = arith.constant 7.812500e-03 : f32
    %8 = vector.broadcast %cst_3 : f32 to vector<8x1xf32>
    %9 = arith.mulf %5, %8 : vector<8x1xf32>
    %10 = arith.mulf %7, %7 : vector<8x1xf32>
    %11 = arith.subf %9, %10 : vector<8x1xf32>
    %cst_4 = arith.constant 0.000000e+00 : f32
    %12 = vector.broadcast %cst_4 : f32 to vector<8x1xf32>
    %13 = arith.maximumf %11, %12 : vector<8x1xf32>
    %14 = math.sqrt %13 : vector<8x1xf32>
    %cst_5 = arith.constant 9.99999997E-7 : f32
    %15 = vector.broadcast %cst_5 : f32 to vector<8x1xf32>
    %16 = arith.addf %14, %15 : vector<8x1xf32>
    %17 = tpu.reciprocal %16 : vector<8x1xf32> -> vector<8x1xf32>
    %c0_6 = arith.constant 0 : index
    %c0_7 = arith.constant 0 : index
    %18 = vector.load %arg2[%c0_6, %c0_7] : memref<1x128xf32, #tpu.memory_space<vmem>>, vector<1x128xf32>
    %c0_8 = arith.constant 0 : index
    %c0_9 = arith.constant 0 : index
    %19 = vector.load %arg3[%c0_8, %c0_9] : memref<1x128xf32, #tpu.memory_space<vmem>>, vector<1x128xf32>
    %20 = vector.broadcast %7 : vector<8x1xf32> to vector<8x128xf32>
    %21 = arith.subf %0, %20 : vector<8x128xf32>
    %22 = vector.broadcast %17 : vector<8x1xf32> to vector<8x128xf32>
    %23 = arith.mulf %21, %22 : vector<8x128xf32>
    %24 = vector.broadcast %18 : vector<1x128xf32> to vector<8x128xf32>
    %25 = arith.mulf %24, %23 : vector<8x128xf32>
    %26 = vector.broadcast %19 : vector<1x128xf32> to vector<8x128xf32>
    %27 = arith.addf %25, %26 : vector<8x128xf32>
    %c0_10 = arith.constant 0 : index
    %c0_11 = arith.constant 0 : index
    %28 = vector.load %arg4[%c0_10, %c0_11] : memref<8x128xf32, #tpu.memory_space<vmem>>, vector<8x128xf32>
    tpu.vector_store %arg4[%c0_10, %c0_11], %27 {strides = array<i32>} : memref<8x128xf32, #tpu.memory_space<vmem>>, vector<8x128xf32>,
    return
  }
  func.func @transform_0(%arg0: i32) -> (i32, i32) {
    %c0_i32 = arith.constant 0 : i32
    %c0_i32_0 = arith.constant 0 : i32
    return %arg0, %c0_i32 : i32, i32
  }
  func.func @transform_1(%arg0: i32) -> (i32, i32) {
    %c0_i32 = arith.constant 0 : i32
    %c0_i32_0 = arith.constant 0 : i32
    %c0_i32_1 = arith.constant 0 : i32
    return %c0_i32, %c0_i32_0 : i32, i32
  }
  func.func @transform_2(%arg0: i32) -> (i32, i32) {
    %c0_i32 = arith.constant 0 : i32
    %c0_i32_0 = arith.constant 0 : i32
    %c0_i32_1 = arith.constant 0 : i32
    return %c0_i32, %c0_i32_0 : i32, i32
  }
  func.func @transform_3(%arg0: i32) -> (i32, i32) {
    %c0_i32 = arith.constant 0 : i32
    %c0_i32_0 = arith.constant 0 : i32
    return %arg0, %c0_i32 : i32, i32
  }
}

</mosaic_0001>

<bundles_post_ra>
// kernel: tpu_custom_call.1
= control target key start
LH: loop header
LB: loop body
LE: loop exit
PB: predicated region body
PF: predicated region fallthrough
CT: control target
= control target key end

     0   :  { %8 = vsyncpa [#allocation3], 0  ;;  %s640_s0 = inlined_call_operand.hbm [shape: f32[16,128], index: 0, kind: input, shape index: {}]   ;;  %s641_s1 = inlined_call_operand.vmem [shape: f32[1,128], index: 1, kind: input, shape index: {}]   ;;  %s642_s2 = inlined_call_operand.vmem [shape: f32[1,128], index: 2, kind: input, shape index: {}]   ;;  %s643_s3 = inlined_call_operand.hbm [shape: f32[16,128], index: 3, kind: output, shape index: {}]  }
   0x1   :  { %10 = vsyncpa [#allocation3 + $0x1], 0 }
   0x2   :  { %11 = vsyncpa [#allocation4], 0 }
   0x3   :  { %13 = vsyncpa [#allocation4 + $0x1], 0  ;;  %s489_s12 = smov 0   ;;  %s491_s13 = smov 0  }
   0x4   :  { %s493_s14 = smov 0   ;;  %s495_s15 = smov 0  }
   0x5 LB: > { %s510_s16 = sadd.s32 4294967295, %s465_s15   ;;  %s309_s17 = sadd.s32 4294967294, %s465_s15   ;;  %s465_s15 = sphi %s495_s15, %s660_s15   ;;  %s461_s14 = sphi %s493_s14, %s659_s14   ;;  %s457_s13 = sphi %s491_s13, %s658_s13   ;;  %s453_s12 = sphi %s489_s12, %s657_s12  }
   0x6   : > { %s514_s18 = sadd.s32 1, %s465_s15   ;;  %s26_s19 = sadd.s32 1, %s461_s14 }
   0x7   : > { %s23_s20 = ssub.s32 %s465_s15, %s514_s18  ;;  %p33_p0 = scmp.ne.s32.totalorder %s461_s14, %s457_s13 }
   0x8   : > { %p24_p1 = scmp.eq.s32.totalorder %s23_s20, 0  ;;  %p34_p2 = scmp.eq.s32.totalorder %s465_s15, 0 }
   0x9   : > { %p39_p3 = scmp.ne.s32.totalorder %s457_s13, %s453_s12  ;;  %p40_p4 = scmp.eq.s32.totalorder %s510_s16, 0 }
   0xa   : > { %s526_s21 = scalar_select %p24_p1, %s461_s14, %s26_s19  }
   0xb   : > { %p528_p5 = por %p34_p2, %p33_p0  ;;  %p532_p6 = por %p40_p4, %p39_p3 }
   0xc   : > { %p105_p7 = scmp.eq.s32.totalorder %s510_s16, 1  ;;  %p111_p8 = scmp.eq.s32.totalorder %s309_s17, 1 }
   0xd   : > { %s647_s23 = scalar_select %p532_p6, 1, 0 }
   0xe   : > { %p335_p10 = scmp.lt.s32.totalorder %s465_s15, 2  ;;  %p539_p11 = por %p105_p7, %p33_p0 }
   0xf   : > { %p543_p12 = por %p111_p8, %p39_p3  ;;  %s137_s26 = sand.u32 1, %s461_s14  }
  0x10   : > { %s648_s24 = scalar_select %p539_p11, 1, 0 }
  0x11   : > { %s649_s25 = scalar_select %p543_p12, 1, 0 }
  0x12   : > { %s313_s27 = sshll.u32 %s465_s15, 7  ;;  %s312_s28 = sshll.u32 %s137_s26, 3 }
  0x13   : > { %s552_s4 = scalar_lea.hbm %s640_s0, %s313_s27  ;;  %s141_s5 = scalar_lea.vmem [#allocation2], %s312_s28 }
  0x14   : > { %s148_s6 = sshll.u32 %s141_s5, 4  ;;  %p556_p13 = pnand %p335_p10, %p528_p5  ;;  %s560_s6 = int_to_ptr.vmem [resolvable:$true] %s148_s6 }
  0x15   : > { %s138_s8 = scalar_lea.sflag [#allocation3], %s137_s26  ;;  %s373_s9 = scalar_lea.hbm %s552_s4, 128 }
  0x16   : > { %p374_p2 = scmp.ne.s32.totalorder %s552_s4, %s373_s9  ;;  %p375_p3 = pneg %p556_p13 }
  0x17   : > { %s378_s17 = scalar_lea.hbm %s640_s0, 256  ;;  %p379_p5 = scmp.lt.s32.totalorder %s552_s4, %s640_s0 }
  0x18   : > { %p376_p4 = pnand %p375_p3, %p374_p2  ;;  %p380_p8 = scmp.lt.s32.totalorder %s378_s17, %s373_s9 }
  0x1a   : > { %p377_p7 = pneg %p376_p4  ;;  %p381_p10 = por %p380_p8, %p379_p5 }
  0x1c   : > { %p382_p9 = pnand %p381_p10, %p377_p7 }
  0x1e   : > { %385 = shalt.err (!%p382_p9)
}
  0x1f   : > { %s386_s22 = scalar_lea.vmem %s560_s6, 128  ;;  %s467_s26 = smov [#allocation2]  }
  0x20   : > { %p387_p0 = scmp.ne.s32.totalorder %s560_s6, %s386_s22  ;;  %s391_s27 = sshll.u32 %s467_s26, 4  ;;  %s392_s27 = int_to_ptr.vmem [resolvable:$false] %s391_s27 }
  0x21   : > { %s393_s28 = scalar_lea.vmem %s392_s27, 256  ;;  %p394_p4 = scmp.lt.s32.totalorder %s560_s6, %s392_s27 }
  0x22   : > { %p389_p1 = pnand %p387_p0, %p375_p3  ;;  %p395_p12 = scmp.lt.s32.totalorder %s393_s28, %s386_s22 }
  0x24   : > { %p390_p2 = pneg %p389_p1  ;;  %p396_p11 = por %p395_p12, %p394_p4 }
  0x26   : > { %p397_p6 = pnand %p396_p11, %p390_p2 }
  0x28   : > { %400 = shalt.err (!%p397_p6)
}
  0x29   : > { %330 = dma.hbm_to_vmem [thread:$0]  (!%p556_p13), %s552_s4, 128, %s560_s6, %s138_s8  }
  0x2a   : > { %p651_p9 = scmp.lt.s32.totalorder %s465_s15, 3  ;;  %p652_p7 = scmp.ge.s32.totalorder %s465_s15, 1 }
  0x2c   : > { %p154_p0 = pnand %p652_p7, %p651_p9 }
  0x2d   : > { %s587_s29 = sand.u32 (!%p154_p0), 1, %s457_s13   ;;  %p653_p6 = scmp.ne.s32.totalorder (!%p154_p0), %s647_s23, 0 }
  0x2e   : > { %157 = sbr.rel (%p154_p0) target bundleno = 254 (0xfe), region = 32  ;;  %s315_s30 = sshll.u32 (!%p154_p0), %s587_s29, 3 }
  0x2f   : > { %s160_s5 = scalar_lea.sflag (!%p154_p0), [#allocation3], %s587_s29  ;;  %s163_s7 = scalar_lea.vmem (!%p154_p0), [#allocation2], %s315_s30 }
  0x33   : > { %444 = dma.done.wait (%p653_p6), %s160_s5, 128  }
  0x34   : > { %446 = vsyncadd (%p653_p6), %s160_s5, 4294967168  ;;  %v186_v0 = vld [vmem:[%s163_s7] sm:$0xff]  ;;  %s320_s9 = sshll.u32 %s510_s16, 7  ;;  %s185_s10 = scalar_lea.vmem [#allocation5], %s315_s30 }
  0x35   : > { %187 = vadd.xlane.f32.xlu0 %v186_v0  ;;  %v189_v1 = vmul.f32 %v186_v0, %v186_v0  ;;  %v317_v17 = vld [vmem:[%s641_s1] ss:$0 sm:$0xff]  ;;  %s239_s11 = sshll.u32 %s185_s10, 4  ;;  %s237_s20 = scalar_lea.hbm %s643_s3, %s320_s9  ;;  %s240_s11 = int_to_ptr.vmem [resolvable:$true] %s239_s11 }
  0x36   : > { %v318_v19 = vld [vmem:[%s642_s2] ss:$0 sm:$0xff]  ;;  %s226_s22 = scalar_lea.sflag [#allocation4], %s587_s29  ;;  %s401_s26 = scalar_lea.vmem %s240_s11, 128 }
  0x37   : > { %p402_p11 = scmp.ne.s32.totalorder %s240_s11, %s401_s26  ;;  %p654_p12 = scmp.ne.s32.totalorder %s648_s24, 0 }
  0x38   : > { %s468_s27 = smov [#allocation5]  }
  0x39   : > { %190 = vadd.xlane.f32.xlu0 %v189_v1  ;;  %p403_p13 = pnand %p402_p11, %p654_p12  ;;  %s405_s28 = sshll.u32 %s468_s27, 4  ;;  %s406_s28 = int_to_ptr.vmem [resolvable:$false] %s405_s28 }
  0x3a   : > { %s407_s16 = scalar_lea.vmem %s406_s28, 256  ;;  %p408_p3 = scmp.lt.s32.totalorder %s240_s11, %s406_s28 }
  0x3b   : > { %p404_p1 = pneg %p403_p13  ;;  %p409_p5 = scmp.lt.s32.totalorder %s407_s16, %s401_s26 }
  0x3d   : > { %p410_p8 = por %p409_p5, %p408_p3 }
  0x3f   : > { %p411_p10 = pnand %p410_p8, %p404_p1 }
  0xbe   : > { %v188_v2 = vpop.xlane.xlu0 %187 }
  0xbf   : > { %v192_v3 = vmul.f32 0.0078125, %v188_v2 }
  0xc1   : > { %v194_v5 = vmul.f32 %v192_v3, %v192_v3  ;;  %v208_v15 = vsub.f32 %v186_v0, %v192_v3 }
  0xc2   : > { %v191_v4 = vpop.xlane.xlu0 %190 }
  0xc3   : > { %v193_v6 = vmul.f32 0.0078125, %v191_v4 }
  0xc5   : > { %v195_v7 = vsub.f32 %v193_v6, %v194_v5 }
  0xc7   : > { %v196_v8 = vmax.f32 %v195_v7, 0.0 }
  0xc9   : > { %369 = vrsqrt.f32 %v196_v8  ;;  %vm199_vm0 = vcmp.eq.f32.partialorder %v196_v8, inf  ;;  %v202_v11 = vand.u32 2147483648, %v196_v8  ;;  %vm201_vm1 = vcmp.eq.f32.partialorder %v196_v8, 0.0 }
  0xd6   : > { %v370_v9 = vpop.eup %369 }
  0xd7   : > { %v198_v10 = vmul.f32 %v370_v9, %v196_v8 }
  0xd9   : > { %v200_v12 = vsel %vm199_vm0, %v196_v8, %v198_v10 }
  0xda   : > { %v203_v13 = vsel %vm201_vm1, %v202_v11, %v200_v12 }
  0xdb   : > { %v204_v14 = vadd.f32 1e-06, %v203_v13 }
  0xdd   : > { %371 = vrcp.f32 %v204_v14 }
  0xea   : > { %v372_v16 = vpop.eup %371 }
  0xeb   : > { %v209_v18 = vmul.f32 %v372_v16, %v208_v15 }
  0xed   : > { %v216_v20 = vmul.f32 %v317_v17, %v209_v18 }
  0xef   : > { %v223_v21 = vadd.f32 %v318_v19, %v216_v20 }
  0xf1   : > { %224 = vst [vmem:[%s185_s10] sm:$0xff] %v223_v21 }
  0xf2   : > { %414 = shalt.err (!%p411_p10)
}
  0xf3   : > { %s415_s30 = scalar_lea.hbm %s237_s20, 128  ;;  %s419_s7 = scalar_lea.hbm %s643_s3, 256 }
  0xf4   : > { %p416_p2 = scmp.ne.s32.totalorder %s237_s20, %s415_s30  ;;  %p420_p7 = scmp.lt.s32.totalorder %s237_s20, %s643_s3 }
  0xf5   : > { %p421_p0 = scmp.lt.s32.totalorder %s419_s7, %s415_s30 }
  0xf6   : > { %p417_p4 = pnand %p416_p2, %p654_p12 }
  0xf7   : > { %p422_p6 = por %p421_p0, %p420_p7 }
  0xf8   : > { %p418_p9 = pneg %p417_p4 }
  0xfa   : > { %p423_p11 = pnand %p422_p6, %p418_p9 }
  0xfc   : > { %426 = shalt.err (!%p423_p11)
}
  0xfd   : > { %325 = dma.vmem_to_hbm [thread:$0]  (%p654_p12), %s240_s11, 128, %s237_s20, %s226_s22  }
  0xfe PF: > { %s251_s6 = sand.u32 1, %s453_s12   ;;  %p655_p13 = scmp.ne.s32.totalorder %s649_s25, 0 }
  0xff   : > { %p656_p1 = scmp.ge.s32.totalorder %s465_s15, 2  ;;  %s252_s8 = scalar_lea.sflag [#allocation4], %s251_s6 }
 0x101   : > { %p332_p3 = pnand %p656_p1, %p655_p13 }
 0x103   : > { %p333_p5 = pneg %p332_p3 }
 0x105   : > { %448 = dma.done.wait (%p333_p5), %s252_s8, 128  }
 0x106   : > { %450 = vsyncadd (%p333_p5), %s252_s8, 4294967168  ;;  %p16_p8 = scmp.ge.s32.totalorder %s514_s18, 4   ;;  %s657_s12 = smov %s457_s13 }
 0x107   : > { %s658_s13 = smov %s461_s14  ;;  %s659_s14 = smov %s526_s21 }
 0x108   : > { %s660_s15 = smov %s514_s18  ;;  %18 = sbr.rel (!%p16_p8) target bundleno = 5 (0x5), region = 77 }
 0x10d   :  { %257 = vsyncpa [#allocation3], 1 }
 0x10e   :  { %259 = vsyncpa [#allocation3 + $0x1], 1 }
 0x10f   :  { %260 = vsyncpa [#allocation4], 1 }
 0x110   :  { %262 = vsyncpa [#allocation4 + $0x1], 1 }

</bundles_post_ra>
